<compile_context>
chip_gen: v7x
topology: tpu7x:2x2x1
jax: 0.10.0
libtpu: 0.0.40
codegen_flags: <defaults>
</compile_context>

<pallas_src>
import functools

import jax
import jax.numpy as jnp
from jax.experimental import pallas as pl
from jax.experimental.pallas import tpu as pltpu


def _round_up(x, m):
    return -(-x // m) * m


def _mask_conv_kernel(lengths_ref, tidx_ref, win_ref, w_ref, bias_ref, out_ref,
                      patch_ref, *, t_ph, m_tile, pc, dh_max, dw_max):
    """One grid step = (m tile mi, batch element b).

    lengths_ref : SMEM int32[B]                    scalar-prefetched output lengths
    tidx_ref    : VMEM int32[1, m_tile]            per-tile output-time indices
    win_ref     : VMEM bf16[1, 1, PC, W]           flattened phase-slab window (+halo)
    w_ref       : VMEM bf16[C_out, KB]             regrouped Conv2d weight
    bias_ref    : VMEM f32 [C_out, 1]
    out_ref     : VMEM bf16[1, C_out, m_tile]
    patch_ref   : VMEM bf16[KB, m_tile]            scratch: in-kernel im2col result
    """
    b = pl.program_id(1)
    length = lengths_ref[b]

    # ---- in-kernel im2col: (dh, dw) tap groups; each copy is a dense (PC, m_tile)
    # slab slice at a static offset (dh*T_ph + dw), so no HBM patches array is needed.
    g = 0
    for dh in range(dh_max + 1):
        for dw in range(dw_max + 1):
            off = dh * t_ph + dw
            patch_ref[g * pc:(g + 1) * pc, :] = win_ref[0, 0, :, off:off + m_tile]
            g += 1

    # ---- Conv2d as one MXU matmul; result stays lane-dense: (C_out, m_tile).
    y = jnp.dot(w_ref[...], patch_ref[...], preferred_element_type=jnp.float32)
    y = y + bias_ref[...]

    # ---- Hardtanh(0, 20) then length mask (subsumes the per-module masked_fill's;
    # it also zeroes the T_ph >= t >= T_out lane-padding columns).
    y = jnp.clip(y, 0.0, 20.0)
    y = jnp.where(tidx_ref[...] >= length, 0.0, y)
    out_ref[0] = y.astype(out_ref.dtype)


def _choose_row_tile(d_out, t_ph, pc, kb, c_out, dh_max, *,
                     cap=16384, budget_bytes=20 << 20):
    """Rows of D_out per tile: big tiles (amortize ~0.35us/step), VMEM-budgeted
    (double-buffered blocks; budget fits v7x's 32 MiB scoped default), and >= 2
    m-tiles when possible so megacore can split the m axis even for small/odd B."""
    r = max(1, min(cap // t_ph, d_out))
    if r >= d_out and d_out >= 2:
        r = -(-d_out // 2)

    def step_bytes(rr):
        m = rr * t_ph
        w = m + dh_max * t_ph + 128
        return 2 * (pc * w * 2) + 2 * (c_out * m * 2) + kb * m * 2 + 2 * (m * 4)

    while r > 1 and step_bytes(r) > budget_bytes:
        r = max(1, r // 2)
    return r


def mask_module_forward(x, x_lengths, weight, bias, *, stride, padding,
                        compute_dtype=jnp.bfloat16, out_dtype=jnp.bfloat16):
    """x: (B, C_in, D, T) float32 NCHW; x_lengths: (B,).  Returns (y, lengths)."""
    B, C_in, D, T = x.shape
    C_out, _, kH, kW = weight.shape
    sH, sW = stride
    pH, pW = padding

    D_out = (D + 2 * pH - kH) // sH + 1
    T_out = (T + 2 * pW - kW) // sW + 1

    # get_seq_lens (Conv2d branch, dilation=1), truncating division like PyTorch.
    num = x_lengths.astype(jnp.int32) + 2 * pW - (kW - 1) - 1
    q = jnp.where(num >= 0, num // sW, -((-num) // sW))
    lengths = (q + 1).astype(jnp.int32)

    dh_max = (kH - 1) // sH
    dw_max = (kW - 1) // sW
    PC = sH * sW * C_in                       # stride phases x input channels
    KB = (dh_max + 1) * (dw_max + 1) * PC     # grouped-tap contraction size (>= C_in*kH*kW)

    # Lane-dense, halo-safe row pitch; also the padded output time width.
    T_ph = _round_up(max(T_out + dw_max, 128), 128)
    r_tile = _choose_row_tile(D_out, T_ph, PC, KB, C_out, dh_max)
    m_tile = r_tile * T_ph
    grid_m = -(-D_out // r_tile)
    halo = dh_max * T_ph + _round_up(max(dw_max, 1), 128)
    W = m_tile + halo
    n_flat = (grid_m - 1) * m_tile + W
    D_ph = -(-n_flat // T_ph)

    # ---- stride-phase decomposition (O(1) inflation) flattened to pitch T_ph.
    # phases[b, (ph,pw,c), i, j] = x_pad[b, c, i*sH + ph, j*sW + pw]
    D_pad2, T_pad2 = sH * D_ph, sW * T_ph
    xp = jnp.pad(x, ((0, 0), (0, 0),
                     (pH, max(0, D_pad2 - D - pH)),
                     (pW, max(0, T_pad2 - T - pW))))[:, :, :D_pad2, :T_pad2]
    phases = xp.reshape(B, C_in, D_ph, sH, T_ph, sW).transpose(0, 3, 5, 1, 2, 4)
    slab = phases.reshape(B, PC, D_ph * T_ph).astype(compute_dtype)

    # Overlapping per-tile windows (only the dh/dw halo is duplicated) so every
    # in-kernel slice start is static; correctness of the padded last tile relies on
    # Pallas clipping the output writeback to the array bounds.
    windows = jnp.stack(
        [slab[:, :, i * m_tile:i * m_tile + W] for i in range(grid_m)], axis=1
    )                                                       # (B, grid_m, PC, W)

    # Conv2d weight regrouped to (dh, dw, ph, pw, c) columns; out-of-range taps -> 0.
    cols = []
    zero = jnp.zeros((C_out,), weight.dtype)
    for dh in range(dh_max + 1):
        for dw in range(dw_max + 1):
            for ph_ in range(sH):
                for pw_ in range(sW):
                    for c in range(C_in):
                        kh, kw = dh * sH + ph_, dw * sW + pw_
                        cols.append(weight[:, c, kh, kw] if (kh < kH and kw < kW)
                                    else zero)
    w_big = jnp.stack(cols, axis=1).astype(compute_dtype)    # (C_out, KB)
    bias_col = bias.reshape(C_out, 1).astype(jnp.float32)

    # Per-tile output-time index (tiles are row-aligned, so it is mi-independent).
    t_idx = jnp.tile(jnp.arange(T_ph, dtype=jnp.int32), r_tile)[None, :]  # (1, m_tile)

    kernel = functools.partial(_mask_conv_kernel, t_ph=T_ph, m_tile=m_tile, pc=PC,
                               dh_max=dh_max, dw_max=dw_max)
    out = pl.pallas_call(
        kernel,
        out_shape=jax.ShapeDtypeStruct((B, C_out, D_out * T_ph), out_dtype),
        grid_spec=pltpu.PrefetchScalarGridSpec(
            num_scalar_prefetch=1,                            # lengths -> SMEM
            grid=(grid_m, B),
            in_specs=[
                pl.BlockSpec((1, m_tile), lambda mi, b, lens: (0, 0)),
                pl.BlockSpec((1, 1, PC, W), lambda mi, b, lens: (b, mi, 0, 0)),
                pl.BlockSpec((C_out, KB), lambda mi, b, lens: (0, 0)),
                pl.BlockSpec((C_out, 1), lambda mi, b, lens: (0, 0)),
            ],
            out_specs=pl.BlockSpec((1, C_out, m_tile), lambda mi, b, lens: (b, 0, mi)),
            scratch_shapes=[pltpu.VMEM((KB, m_tile), compute_dtype)],
        ),
        compiler_params=pltpu.CompilerParams(
            dimension_semantics=("parallel", "parallel"),
            vmem_limit_bytes=32 * 1024 * 1024,
        ),
    )(lengths, t_idx, windows, w_big, bias_col)

    y = out.reshape(B, C_out, D_out, T_ph)[..., :T_out]       # drop lane padding
    return y, lengths


def reference_forward(x, x_lengths, weight, bias, *, stride, padding):
    """Pure-JAX f32 reference with identical semantics (for correctness check)."""
    y = jax.lax.conv_general_dilated(
        x, weight, window_strides=stride,
        padding=[(padding[0], padding[0]), (padding[1], padding[1])],
        dimension_numbers=("NCHW", "OIHW", "NCHW"),
    ) + bias.reshape(1, -1, 1, 1)
    kW, sW, pW = weight.shape[3], stride[1], padding[1]
    num = x_lengths.astype(jnp.int32) + 2 * pW - (kW - 1) - 1
    q = jnp.where(num >= 0, num // sW, -((-num) // sW))
    lengths = (q + 1).astype(jnp.int32)
    T_out = y.shape[3]
    t = jnp.arange(T_out)
    mask = (t[None, :] >= lengths[:, None])[:, None, None, :]
    y = jnp.where(mask, 0.0, y)
    y = jnp.clip(y, 0.0, 20.0)
    y = jnp.where(mask, 0.0, y)
    return y, lengths


if __name__ == "__main__":
    # Small, deterministic shapes: B=2, C_in=1, D(freq)=16, T(time)=32, C_out=8.
    # -> D_out=8, T_out=16 (padded to T_ph=128 lanes inside the kernel).
    B, C_in, D, T = 2, 1, 16, 32
    C_out, kH, kW = 8, 5, 5
    stride, padding = (2, 2), (2, 2)

    key = jax.random.PRNGKey(0)
    kx, kw, kb = jax.random.split(key, 3)
    x = jax.random.normal(kx, (B, C_in, D, T), dtype=jnp.float32)
    weight = 0.1 * jax.random.normal(kw, (C_out, C_in, kH, kW), dtype=jnp.float32)
    bias = 0.1 * jax.random.normal(kb, (C_out,), dtype=jnp.float32)
    x_lengths = jnp.array([32, 20], dtype=jnp.int32)   # second sample is padded in time

    y, lengths = mask_module_forward(x, x_lengths, weight, bias,
                                     stride=stride, padding=padding)
    y = jax.block_until_ready(y)
    lengths = jax.block_until_ready(lengths)

    y_ref, lengths_ref = reference_forward(x, x_lengths, weight, bias,
                                           stride=stride, padding=padding)
    assert y.shape == (B, C_out, 8, 16) and y.dtype == jnp.bfloat16
    assert lengths.dtype == jnp.int32
    assert jnp.array_equal(lengths, lengths_ref)
    # bf16 MXU inputs + bf16 output (f32 accumulation) vs the pure-f32 reference.
    assert jnp.allclose(y, y_ref, atol=5e-2, rtol=5e-2)
    # Masked time steps must be exactly zero.
    assert jnp.all(y[1, :, :, int(lengths[1]):] == 0.0)

    print("KERNEL_OK")
</pallas_src>

<mosaic_0001>
module attributes {stable_mosaic.version = 11 : i64} {
  func.func @_mask_conv_kernel(%arg0: i32, %arg1: i32, %arg2: memref<2xi32, #tpu.memory_space<smem>>, %arg3: memref<1x512xi32, #tpu.memory_space<vmem>>, %arg4: memref<1x1x4x896xbf16, #tpu.memory_space<vmem>>, %arg5: memref<8x36xbf16, #tpu.memory_space<vmem>>, %arg6: memref<8x1xf32, #tpu.memory_space<vmem>>, %arg7: memref<1x8x512xbf16, #tpu.memory_space<vmem>>, %arg8: memref<36x512xbf16, #tpu.memory_space<vmem>>) attributes {dimension_semantics = [#tpu.dimension_semantics<parallel>, #tpu.dimension_semantics<parallel>], iteration_bounds = array<i64: 2, 2>, scalar_prefetch = 1 : i64, scratch_operands = 1 : i64, tpu.core_type = #tpu.core_type<tc>, window_params = [{pipeline_mode = #tpu.pipeline_mode<synchronous>, transform_indices = @transform_0, window_bounds = array<i64: 1, 512>}, {transform_indices = @transform_1, window_bounds = array<i64: 1, 1, 4, 896>}, {pipeline_mode = #tpu.pipeline_mode<synchronous>, transform_indices = @transform_2, window_bounds = array<i64: 8, 36>}, {pipeline_mode = #tpu.pipeline_mode<synchronous>, transform_indices = @transform_3, window_bounds = array<i64: 8, 1>}, {transform_indices = @transform_4, window_bounds = array<i64: 1, 8, 512>}]} {
    %0 = arith.index_cast %arg1 : i32 to index
    %1 = memref.load %arg2[%0] : memref<2xi32, #tpu.memory_space<smem>>
    %c0 = arith.constant 0 : index
    %c0_0 = arith.constant 0 : index
    %c0_1 = arith.constant 0 : index
    %c0_2 = arith.constant 0 : index
    %2 = vector.load %arg4[%c0, %c0_0, %c0_1, %c0_2] : memref<1x1x4x896xbf16, #tpu.memory_space<vmem>>, vector<1x1x4x512xbf16>
    %3 = vector.shape_cast %2 : vector<1x1x4x512xbf16> to vector<4x512xbf16>
    %c0_3 = arith.constant 0 : index
    %c0_4 = arith.constant 0 : index
    %4 = vector.load %arg8[%c0_3, %c0_4] : memref<36x512xbf16, #tpu.memory_space<vmem>>, vector<4x512xbf16>
    tpu.vector_store %arg8[%c0_3, %c0_4], %3 {strides = array<i32>} : memref<36x512xbf16, #tpu.memory_space<vmem>>, vector<4x512xbf16>,
    %c0_5 = arith.constant 0 : index
    %c0_6 = arith.constant 0 : index
    %c0_7 = arith.constant 0 : index
    %c1 = arith.constant 1 : index
    %5 = vector.load %arg4[%c0_5, %c0_6, %c0_7, %c1] : memref<1x1x4x896xbf16, #tpu.memory_space<vmem>>, vector<1x1x4x512xbf16>
    %6 = vector.shape_cast %5 : vector<1x1x4x512xbf16> to vector<4x512xbf16>
    %c4 = arith.constant 4 : index
    %c0_8 = arith.constant 0 : index
    %7 = vector.load %arg8[%c4, %c0_8] : memref<36x512xbf16, #tpu.memory_space<vmem>>, vector<4x512xbf16>
    tpu.vector_store %arg8[%c4, %c0_8], %6 {strides = array<i32>} : memref<36x512xbf16, #tpu.memory_space<vmem>>, vector<4x512xbf16>,
    %c0_9 = arith.constant 0 : index
    %c0_10 = arith.constant 0 : index
    %c0_11 = arith.constant 0 : index
    %c2 = arith.constant 2 : index
    %8 = vector.load %arg4[%c0_9, %c0_10, %c0_11, %c2] : memref<1x1x4x896xbf16, #tpu.memory_space<vmem>>, vector<1x1x4x512xbf16>
    %9 = vector.shape_cast %8 : vector<1x1x4x512xbf16> to vector<4x512xbf16>
    %c8 = arith.constant 8 : index
    %c0_12 = arith.constant 0 : index
    %10 = vector.load %arg8[%c8, %c0_12] : memref<36x512xbf16, #tpu.memory_space<vmem>>, vector<4x512xbf16>
    tpu.vector_store %arg8[%c8, %c0_12], %9 {strides = array<i32>} : memref<36x512xbf16, #tpu.memory_space<vmem>>, vector<4x512xbf16>,
    %c0_13 = arith.constant 0 : index
    %c0_14 = arith.constant 0 : index
    %c0_15 = arith.constant 0 : index
    %c128 = arith.constant 128 : index
    %11 = vector.load %arg4[%c0_13, %c0_14, %c0_15, %c128] : memref<1x1x4x896xbf16, #tpu.memory_space<vmem>>, vector<1x1x4x512xbf16>
    %12 = vector.shape_cast %11 : vector<1x1x4x512xbf16> to vector<4x512xbf16>
    %c12 = arith.constant 12 : index
    %c0_16 = arith.constant 0 : index
    %13 = vector.load %arg8[%c12, %c0_16] : memref<36x512xbf16, #tpu.memory_space<vmem>>, vector<4x512xbf16>
    tpu.vector_store %arg8[%c12, %c0_16], %12 {strides = array<i32>} : memref<36x512xbf16, #tpu.memory_space<vmem>>, vector<4x512xbf16>,
    %c0_17 = arith.constant 0 : index
    %c0_18 = arith.constant 0 : index
    %c0_19 = arith.constant 0 : index
    %c129 = arith.constant 129 : index
    %14 = vector.load %arg4[%c0_17, %c0_18, %c0_19, %c129] : memref<1x1x4x896xbf16, #tpu.memory_space<vmem>>, vector<1x1x4x512xbf16>
    %15 = vector.shape_cast %14 : vector<1x1x4x512xbf16> to vector<4x512xbf16>
    %c16 = arith.constant 16 : index
    %c0_20 = arith.constant 0 : index
    %16 = vector.load %arg8[%c16, %c0_20] : memref<36x512xbf16, #tpu.memory_space<vmem>>, vector<4x512xbf16>
    tpu.vector_store %arg8[%c16, %c0_20], %15 {strides = array<i32>} : memref<36x512xbf16, #tpu.memory_space<vmem>>, vector<4x512xbf16>,
    %c0_21 = arith.constant 0 : index
    %c0_22 = arith.constant 0 : index
    %c0_23 = arith.constant 0 : index
    %c130 = arith.constant 130 : index
    %17 = vector.load %arg4[%c0_21, %c0_22, %c0_23, %c130] : memref<1x1x4x896xbf16, #tpu.memory_space<vmem>>, vector<1x1x4x512xbf16>
    %18 = vector.shape_cast %17 : vector<1x1x4x512xbf16> to vector<4x512xbf16>
    %c20 = arith.constant 20 : index
    %c0_24 = arith.constant 0 : index
    %19 = vector.load %arg8[%c20, %c0_24] : memref<36x512xbf16, #tpu.memory_space<vmem>>, vector<4x512xbf16>
    tpu.vector_store %arg8[%c20, %c0_24], %18 {strides = array<i32>} : memref<36x512xbf16, #tpu.memory_space<vmem>>, vector<4x512xbf16>,
    %c0_25 = arith.constant 0 : index
    %c0_26 = arith.constant 0 : index
    %c0_27 = arith.constant 0 : index
    %c256 = arith.constant 256 : index
    %20 = vector.load %arg4[%c0_25, %c0_26, %c0_27, %c256] : memref<1x1x4x896xbf16, #tpu.memory_space<vmem>>, vector<1x1x4x512xbf16>
    %21 = vector.shape_cast %20 : vector<1x1x4x512xbf16> to vector<4x512xbf16>
    %c24 = arith.constant 24 : index
    %c0_28 = arith.constant 0 : index
    %22 = vector.load %arg8[%c24, %c0_28] : memref<36x512xbf16, #tpu.memory_space<vmem>>, vector<4x512xbf16>
    tpu.vector_store %arg8[%c24, %c0_28], %21 {strides = array<i32>} : memref<36x512xbf16, #tpu.memory_space<vmem>>, vector<4x512xbf16>,
    %c0_29 = arith.constant 0 : index
    %c0_30 = arith.constant 0 : index
    %c0_31 = arith.constant 0 : index
    %c257 = arith.constant 257 : index
    %23 = vector.load %arg4[%c0_29, %c0_30, %c0_31, %c257] : memref<1x1x4x896xbf16, #tpu.memory_space<vmem>>, vector<1x1x4x512xbf16>
    %24 = vector.shape_cast %23 : vector<1x1x4x512xbf16> to vector<4x512xbf16>
    %c28 = arith.constant 28 : index
    %c0_32 = arith.constant 0 : index
    %25 = vector.load %arg8[%c28, %c0_32] : memref<36x512xbf16, #tpu.memory_space<vmem>>, vector<4x512xbf16>
    tpu.vector_store %arg8[%c28, %c0_32], %24 {strides = array<i32>} : memref<36x512xbf16, #tpu.memory_space<vmem>>, vector<4x512xbf16>,
    %c0_33 = arith.constant 0 : index
    %c0_34 = arith.constant 0 : index
    %c0_35 = arith.constant 0 : index
    %c258 = arith.constant 258 : index
    %26 = vector.load %arg4[%c0_33, %c0_34, %c0_35, %c258] : memref<1x1x4x896xbf16, #tpu.memory_space<vmem>>, vector<1x1x4x512xbf16>
    %27 = vector.shape_cast %26 : vector<1x1x4x512xbf16> to vector<4x512xbf16>
    %c32 = arith.constant 32 : index
    %c0_36 = arith.constant 0 : index
    %28 = vector.load %arg8[%c32, %c0_36] : memref<36x512xbf16, #tpu.memory_space<vmem>>, vector<4x512xbf16>
    tpu.vector_store %arg8[%c32, %c0_36], %27 {strides = array<i32>} : memref<36x512xbf16, #tpu.memory_space<vmem>>, vector<4x512xbf16>,
    %c0_37 = arith.constant 0 : index
    %c0_38 = arith.constant 0 : index
    %29 = vector.load %arg5[%c0_37, %c0_38] : memref<8x36xbf16, #tpu.memory_space<vmem>>, vector<8x36xbf16>
    %c0_39 = arith.constant 0 : index
    %c0_40 = arith.constant 0 : index
    %30 = vector.load %arg8[%c0_39, %c0_40] : memref<36x512xbf16, #tpu.memory_space<vmem>>, vector<36x512xbf16>
    %cst = arith.constant dense<0.000000e+00> : vector<8x512xf32>
    %31 = tpu.matmul %29, %30, %cst {dimension_numbers = #tpu.dot_dimension_numbers<[1], [0], [0], [1], [0, 0, 1, 1], [], []>} : vector<8x36xbf16>, vector<36x512xbf16>, vector<8x512xf32> -> vector<8x512xf32>
    %c0_41 = arith.constant 0 : index
    %c0_42 = arith.constant 0 : index
    %32 = vector.load %arg6[%c0_41, %c0_42] : memref<8x1xf32, #tpu.memory_space<vmem>>, vector<8x1xf32>
    %33 = vector.broadcast %32 : vector<8x1xf32> to vector<8x512xf32>
    %34 = arith.addf %31, %33 : vector<8x512xf32>
    %cst_43 = arith.constant 0.000000e+00 : f32
    %cst_44 = arith.constant 2.000000e+01 : f32
    %35 = vector.broadcast %cst_43 : f32 to vector<8x512xf32>
    %36 = arith.maximumf %35, %34 : vector<8x512xf32>
    %37 = vector.broadcast %cst_44 : f32 to vector<8x512xf32>
    %38 = arith.minimumf %37, %36 : vector<8x512xf32>
    %c0_45 = arith.constant 0 : index
    %c0_46 = arith.constant 0 : index
    %39 = vector.load %arg3[%c0_45, %c0_46] : memref<1x512xi32, #tpu.memory_space<vmem>>, vector<1x512xi32>
    %40 = vector.broadcast %1 : i32 to vector<1x512xi32>
    %41 = arith.cmpi sge, %39, %40 : vector<1x512xi32>
    %cst_47 = arith.constant 0.000000e+00 : f32
    %42 = vector.shape_cast %41 : vector<1x512xi1> to vector<1x512xi1>
    %43 = vector.broadcast %42 : vector<1x512xi1> to vector<8x512xi1>
    %44 = vector.broadcast %cst_47 : f32 to vector<8x512xf32>
    %45 = arith.select %43, %44, %38 : vector<8x512xi1>, vector<8x512xf32>
    %46 = arith.truncf %45 : vector<8x512xf32> to vector<8x512xbf16>
    %c0_48 = arith.constant 0 : index
    %c0_49 = arith.constant 0 : index
    %c0_50 = arith.constant 0 : index
    %47 = vector.load %arg7[%c0_48, %c0_49, %c0_50] : memref<1x8x512xbf16, #tpu.memory_space<vmem>>, vector<1x8x512xbf16>
    %48 = vector.shape_cast %47 : vector<1x8x512xbf16> to vector<8x512xbf16>
    %49 = vector.shape_cast %46 : vector<8x512xbf16> to vector<1x8x512xbf16>
    tpu.vector_store %arg7[%c0_48, %c0_49, %c0_50], %49 {strides = array<i32>} : memref<1x8x512xbf16, #tpu.memory_space<vmem>>, vector<1x8x512xbf16>,
    return
  }
  func.func @transform_0(%arg0: i32, %arg1: i32, %arg2: memref<2xi32, #tpu.memory_space<smem>>) -> (i32, i32) {
    %c0_i32 = arith.constant 0 : i32
    %c0_i32_0 = arith.constant 0 : i32
    %c0_i32_1 = arith.constant 0 : i32
    return %c0_i32, %c0_i32_0 : i32, i32
  }
  func.func @transform_1(%arg0: i32, %arg1: i32, %arg2: memref<2xi32, #tpu.memory_space<smem>>) -> (i32, i32, i32, i32) {
    %c0_i32 = arith.constant 0 : i32
    %c0_i32_0 = arith.constant 0 : i32
    %c0_i32_1 = arith.constant 0 : i32
    return %arg1, %arg0, %c0_i32, %c0_i32_0 : i32, i32, i32, i32
  }
  func.func @transform_2(%arg0: i32, %arg1: i32, %arg2: memref<2xi32, #tpu.memory_space<smem>>) -> (i32, i32) {
    %c0_i32 = arith.constant 0 : i32
    %c0_i32_0 = arith.constant 0 : i32
    %c0_i32_1 = arith.constant 0 : i32
    return %c0_i32, %c0_i32_0 : i32, i32
  }
  func.func @transform_3(%arg0: i32, %arg1: i32, %arg2: memref<2xi32, #tpu.memory_space<smem>>) -> (i32, i32) {
    %c0_i32 = arith.constant 0 : i32
    %c0_i32_0 = arith.constant 0 : i32
    %c0_i32_1 = arith.constant 0 : i32
    return %c0_i32, %c0_i32_0 : i32, i32
  }
  func.func @transform_4(%arg0: i32, %arg1: i32, %arg2: memref<2xi32, #tpu.memory_space<smem>>) -> (i32, i32, i32) {
    %c0_i32 = arith.constant 0 : i32
    %c0_i32_0 = arith.constant 0 : i32
    return %arg1, %c0_i32, %arg0 : i32, i32, i32
  }
}

</mosaic_0001>

<bundles_post_ra>
// kernel: tpu_custom_call.1
= control target key start
LH: loop header
LB: loop body
LE: loop exit
PB: predicated region body
PF: predicated region fallthrough
CT: control target
= control target key end

     0   :  { %s1502_s0 = inlined_call_operand.vmem [shape: s32[2], index: 0, kind: input, shape index: {}]   ;;  %s1503_s1 = inlined_call_operand.vmem [shape: s32[1,512], index: 1, kind: input, shape index: {}]   ;;  %s1504_s2 = inlined_call_operand.hbm [shape: bf16[2,2,4,896], index: 2, kind: input, shape index: {}]   ;;  %s1505_s3 = inlined_call_operand.vmem [shape: bf16[8,36], index: 3, kind: input, shape index: {}]   ;;  %s1506_s4 = inlined_call_operand.vmem [shape: f32[8,1], index: 4, kind: input, shape index: {}]   ;;  %s1507_s5 = inlined_call_operand.hbm [shape: bf16[2,8,1024], index: 5, kind: output, shape index: {}]  }
   0x1   :  { %s10_s20 = sshll.u32 %s1502_s0, 4  ;;  %s11_s20 = int_to_ptr.vmem [resolvable:$true] %s10_s20 }
   0x2   :  { %s1047_s21 = scalar_lea.vmem %s11_s20, 16  ;;  %p1052_p1 = scmp.lt.s32.totalorder %s11_s20, %s11_s20 }
   0x3   :  { %p1048_p0 = scmp.ne.s32.totalorder %s11_s20, %s1047_s21  ;;  %p1053_p2 = scmp.lt.s32.totalorder %s1047_s21, %s1047_s21 }
   0x5   :  { %p1054_p3 = por %p1053_p2, %p1052_p1 }
   0x7   :  { %p1055_p4 = pnand %p1054_p3, %p1048_p0 }
   0x9   :  { %1058 = shalt.err (!%p1055_p4)  }
   0xa   :  { %s1191_s22 = smov [#allocation4]  }
   0xb   :  { %13 = dma.vmem_to_smem %s11_s20, 16, %s1191_s22, [#allocation3] }
   0xc   :  { %1149 = dma.done.wait [#allocation3], 16 }
   0xd   :  { %1150 = vsyncadd [#allocation3], 4294967280 }
   0xe   :  { %15 = sfence }
   0xf   :  { %16 = vsyncpa [#allocation6], 0 }
  0x10   :  { %18 = vsyncpa [#allocation6 + $0x1], 0 }
  0x11   :  { %19 = vsyncpa [#allocation7], 0 }
  0x12   :  { %21 = vsyncpa [#allocation7 + $0x1], 0  ;;  %s1231_s23 = smov 0   ;;  %s1233_s0 = smov 0  }
  0x13   :  { %s1235_s24 = smov 0   ;;  %s1237_s25 = smov 0  }
  0x14   :  { %s1239_s26 = smov 0   ;;  %s1241_s27 = smov 0  }
  0x15   :  { %s1243_s28 = smov 0   ;;  %s1245_s29 = smov 0  }
  0x16 LB: > { %s893_s30 = sadd.s32 4294967295, %s1189_s29   ;;  %s894_s6 = sadd.s32 4294967294, %s1189_s29   ;;  %s1189_s29 = sphi %s1245_s29, %s27_s29   ;;  %s1185_s28 = sphi %s1243_s28, %s1530_s28   ;;  %s1181_s27 = sphi %s1241_s27, %s1529_s27   ;;  %s1177_s26 = sphi %s1239_s26, %s1528_s26   ;;  %s1173_s25 = sphi %s1237_s25, %s1527_s25   ;;  %s1169_s24 = sphi %s1235_s24, %s1526_s24   ;;  %s1165_s0 = sphi %s1233_s0, %s1525_s0   ;;  %s1161_s23 = sphi %s1231_s23, %s1524_s23  }
  0x17   : > { %s36_s7 = sadd.s32 1, %s1181_s27  ;;  %s39_s8 = sadd.s32 1, %s1185_s28 }
  0x18   : > { %p37_p5 = scmp.ge.s32.totalorder %s36_s7, 2  ;;  %s69_s9 = sadd.s32 1, %s1169_s24 }
  0x19   : > { %p76_p6 = scmp.ne.s32.totalorder %s1169_s24, %s1165_s0  ;;  %p77_p7 = scmp.eq.s32.totalorder %s1189_s29, 0 }
  0x1a   : > { %s1532_s7 = smov (%p37_p5, %s36_s7), 0  ;;  %s1534_s8 = smov (!%p37_p5, %s39_s8), %s1185_s28 }
  0x1b   : > { %1511 = sst [smem:[#allocation12_spill]] %s1532_s7  ;;  %s64_s10 = ssub.s32 %s1181_s27, %s1532_s7 }
  0x1c   : > { %p1284_p8 = por %p77_p7, %p76_p6  ;;  %p41_p9 = scmp.ge.s32.totalorder %s1534_s8, 2 }
  0x1d   : > { %p82_p10 = scmp.ne.s32.totalorder %s1165_s0, %s1161_s23  ;;  %p83_p11 = scmp.eq.s32.totalorder %s893_s30, 0 }
  0x1e   : > { %p150_p12 = scmp.eq.s32.totalorder %s893_s30, 3  ;;  %s1536_s8 = smov (%p41_p9, %s1534_s8), 0 }
  0x1f   : > { %1513 = sst [smem:[#allocation13_spill]] %s1536_s8  ;;  %p1292_p13 = por %p83_p11, %p82_p10 }
  0x20   : > { %p1296_p0 = por %p150_p12, %p76_p6  ;;  %s65_s14 = ssub.s32 %s1185_s28, %s1536_s8 }
  0x21   : > { %p156_p1 = scmp.eq.s32.totalorder %s894_s6, 3  ;;  %s66_s15 = sor.u32 %s65_s14, %s64_s10 }
  0x22   : > { %s1515_s13 = scalar_select %p1296_p0, 1, 0 }
  0x23   : > { %p67_p2 = scmp.eq.s32.totalorder %s66_s15, 0  ;;  %p1302_p3 = por %p156_p1, %p82_p10 }
  0x24   : > { %p951_p4 = scmp.lt.s32.totalorder %s1189_s29, 4  ;;  %s185_s17 = sand.u32 1, %s1169_s24  }
  0x25   : > { %s1516_s16 = scalar_select %p1302_p3, 1, 0 }
  0x26   : > { %s1309_s18 = scalar_select %p67_p2, %s1169_s24, %s69_s9  }
  0x27   : > { %s935_s19 = smul.u32 14, %s185_s17  ;;  %p1314_p5 = pnand %p951_p4, %p1284_p8 }
  0x28   : > { %s936_s20 = smul.u32 7, %s1185_s28  ;;  %s186_s11 = scalar_lea.sflag [#allocation6], %s185_s17 }
  0x29   : > { %s937_s22 = smul.u32 14, %s1181_s27  ;;  %s189_s30 = scalar_lea.vmem [#allocation5], %s935_s19 }
  0x2a   : > { %s199_s6 = sshll.u32 %s189_s30, 4  ;;  %p1061_p9 = pneg %p1314_p5  ;;  %s1319_s6 = int_to_ptr.vmem [resolvable:$true] %s199_s6 }
  0x2b   : > { %s195_s10 = sadd.s32 %s937_s22, %s936_s20  ;;  %s1064_s22 = scalar_lea.hbm %s1504_s2, 896 }
  0x2c   : > { %s897_s14 = sshll.u32 %s195_s10, 5 }
  0x2d   : > { %s1325_s8 = scalar_lea.hbm %s1504_s2, %s897_s14 }
  0x2e   : > { %s1059_s7 = scalar_lea.hbm %s1325_s8, 224  ;;  %p1065_p12 = scmp.lt.u32.totalorder %s1325_s8, %s1504_s2 }
  0x2f   : > { %p1060_p8 = scmp.ne.s32.totalorder %s1325_s8, %s1059_s7  ;;  %p1066_p1 = scmp.lt.u32.totalorder %s1064_s22, %s1059_s7 }
  0x30   : > { %p1068_p4 = scmp.lt.u32.totalorder %s1059_s7, %s1325_s8 }
  0x31   : > { %p1062_p10 = pnand %p1061_p9, %p1060_p8  ;;  %p1067_p2 = por %p1066_p1, %p1065_p12 }
  0x33   : > { %p1063_p11 = pneg %p1062_p10  ;;  %p1069_p6 = por %p1068_p4, %p1067_p2 }
  0x35   : > { %p1070_p7 = pnand %p1069_p6, %p1063_p11 }
  0x37   : > { %1073 = shalt.err (!%p1070_p7)
}
  0x38   : > { %s1074_s17 = scalar_lea.vmem %s1319_s6, 224  ;;  %s1192_s14 = smov [#allocation5]  }
  0x39   : > { %p1075_p8 = scmp.ne.s32.totalorder %s1319_s6, %s1074_s17  ;;  %s1079_s15 = sshll.u32 %s1192_s14, 4  ;;  %s1080_s15 = int_to_ptr.vmem [resolvable:$false] %s1079_s15 }
  0x3a   : > { %s1081_s9 = scalar_lea.vmem %s1080_s15, 448  ;;  %p1082_p0 = scmp.lt.s32.totalorder %s1319_s6, %s1080_s15 }
  0x3b   : > { %p1077_p10 = pnand %p1075_p8, %p1061_p9  ;;  %p1083_p12 = scmp.lt.s32.totalorder %s1081_s9, %s1074_s17 }
  0x3d   : > { %p1078_p3 = pneg %p1077_p10  ;;  %p1084_p1 = por %p1083_p12, %p1082_p0 }
  0x3f   : > { %p1085_p2 = pnand %p1084_p1, %p1078_p3 }
  0x41   : > { %1088 = shalt.err (!%p1085_p2)
}
  0x42   : > { %946 = dma.hbm_to_vmem [thread:$0]  (!%p1314_p5), %s1325_s8, 224, %s1319_s6, %s186_s11  }
  0x43   : > { %p1518_p6 = scmp.lt.s32.totalorder %s1189_s29, 5  ;;  %p1519_p7 = scmp.ge.s32.totalorder %s1189_s29, 1 }
  0x45   : > { %p205_p9 = pnand %p1519_p7, %p1518_p6 }
  0x46   : > { %s1358_s7 = sand.u32 (!%p205_p9), 1, %s1165_s0  }
  0x47   : > { %208 = sbr.rel (%p205_p9) target bundleno = 490 (0x1ea), region = 36  ;;  %s211_s20 = scalar_lea.sflag (!%p205_p9), [#allocation6], %s1358_s7 }
  0x48   : > { %s938_s19 = smul.u32 (!%p205_p9), 14, %s1358_s7 }
  0x4a   : > { %s1362_s22 = scalar_lea.vmem (!%p205_p9), [#allocation5], %s938_s19 }
  0x4e   : > { %1152 = dma.done.wait (%p1292_p13), %s211_s20, 224  }
  0x4f   : > { %1154 = vsyncadd (%p1292_p13), %s211_s20, 4294967072  ;;  %v271_v0 = vlaneseq  ;;  %v1193_v1 = vmov 1983009808   ;;  %v263_v7 = vld [vmem:[%s1362_s22] sm:$0xff]  ;;  %s1194_s8 = smov 126   ;;  %s1195_s12 = smov 127  }
  0x50   : > { %v269_v2 = vunpack.c.l.s4 %v1193_v1  ;;  %v902_v6 = vld.sshfl [vmem:[%s1362_s22 + $0x8] sm:$0x3 pattern:$0x76325410]  ;;  %v313_v12 = vcombine.high %v263_v7, %v263_v7  ;;  %v267_v14 = vcombine.low %v263_v7, %v263_v7  ;;  %v1196_v33 = vmov 0   ;;  %s241_s10 = sld [smem:[#allocation4 + %s1173_s25]] }
  0x51   : > { %v1368_v3 = vshrl.u32 %v271_v0, 7  ;;  %v374_v8 = vld [vmem:[%s1362_s22 + $0x2] sm:$0xff]  ;;  %339 = vrot.lane.b32.xlu1 %v902_v6, %s1194_s8  ;;  %900 = vst.sshfl [vmem:[#allocation2] sm:$0xf pattern:$0x76325410] %v263_v7  ;;  %685 = vmatprep.mubr.bf16.mxu0 %v1196_v33 }
  0x52   : > { %v270_v4 = vunpack.c.0.s8 %v269_v2  ;;  %v1024_v10 = vld [vmem:[%s1362_s22 + $0x8] ss:$0 sps:$4 sm:$0x33]   ;;  %v421_v13 = vcombine.low %v374_v8, %v374_v8  ;;  %v378_v18 = vcombine.high %v374_v8, %v374_v8  ;;  %v1028_v23 = vld [vmem:[%s1362_s22 + $0xa] ss:$0 sps:$4 sm:$0x33]   ;;  %726 = vmatprep.mubr.bf16.mxu1 %v1196_v33  ;;  %1022 = vset.pattern.permute.xlu0 %v1196_v33 }
  0x53   : > { %v482_v11 = vld [vmem:[%s1362_s22 + $0x4] sm:$0xff]  ;;  %904 = vst.sshfl [vmem:[#allocation2 + $0x18] sm:$0xf0 pattern:$0x76325410] %v374_v8  ;;  %vm299_vm0 = vcmask 1043456  }
  0x54   : > { %v273_v5 = vsub.s32 %v270_v4, %v1368_v3  ;;  %906 = vst.sshfl [vmem:[#allocation2 + $0x30] sm:$0xf pattern:$0x76325410] %v482_v11  ;;  %v530_v16 = vcombine.high %v482_v11, %v482_v11  ;;  %v486_v26 = vcombine.low %v482_v11, %v482_v11  ;;  %v580_v34 = vld [vmem:[%s1506_s4] sm:$0xff]  ;;  %vm301_vm1 = vcmask 1039360  }
  0x55   : > { %903 = vst.sshfl [vmem:[#allocation2 + $0x10] sm:$0xf0 pattern:$0x76325410] %v421_v13  ;;  %vm345_vm2 = vcmask 1031168   ;;  %vm640_vm3 = vcmask 1041408  }
  0x56   : > { %v281_v9 = vrot.slane %v263_v7, %v273_v5  ;;  %v385_v15 = vrot.slane %v374_v8, %v273_v5  ;;  %901 = vst.sshfl [vmem:[#allocation2 + $0x8] sm:$0xf pattern:$0x76325410] %v313_v12  ;;  %v289_v17 = vrot.slane %v1024_v10, %v273_v5  ;;  %v274_v19 = vrot.slane %v267_v14, %v273_v5  ;;  %s899_s15 = sshll.u32 %s1358_s7, 4  ;;  %s928_s9 = sshll.u32 %s1177_s26, 2 }
  0x57   : > { %907 = vst.sshfl [vmem:[#allocation2 + $0x38] sm:$0xf pattern:$0x76325410] %v530_v16  ;;  %v392_v20 = vrot.slane %v378_v18, %v273_v5  ;;  %v327_v21 = vrot.slane %v313_v12, %v273_v5  ;;  %v428_v22 = vrot.slane %v421_v13, %v273_v5  ;;  %v443_v25 = vrot.slane %v1028_v23, %v273_v5  ;;  %s929_s19 = sshll.u32 %s1173_s25, 3  ;;  %s238_s26 = scalar_lea.vmem [#allocation8], %s899_s15 }
  0x58   : > { %292 = vrot.lane.b32.xlu0 %v281_v9, %s1195_s12  ;;  %335 = vrot.lane.b32.xlu1 %v281_v9, %s1194_s8  ;;  %v905_v24 = vld.sshfl [vmem:[%s1362_s22 + $0xa] sm:$0x3 pattern:$0x76325410]  ;;  %v500_v27 = vrot.slane %v482_v11, %v273_v5  ;;  %v493_v28 = vrot.slane %v486_v26, %v273_v5  ;;  %v544_v32 = vrot.slane %v530_v16, %v273_v5  ;;  %vm636_vm4 = vcmask 293888   ;;  %s802_s20 = sadd.s32 %s929_s19, %s928_s9  ;;  %s790_s6 = scalar_lea.sflag [#allocation7], %s1358_s7 }
  0x59   : > { %v1030_v29 = vld [vmem:[%s1362_s22 + $0xc] ss:$0 sps:$4 sm:$0x33]   ;;  %s930_s25 = sshll.u32 %s802_s20, 6  ;;  %p1520_p0 = scmp.ne.s32.totalorder %s1515_s13, 0 }
  0x5a   : > { %v508_v30 = vrot.slane %v1030_v29, %v273_v5  ;;  %v908_v31 = vld.sshfl [vmem:[%s1362_s22 + $0xc] sm:$0x3 pattern:$0x76325410]  ;;  %s806_s22 = sshll.u32 %s238_s26, 4  ;;  %s1448_s21 = scalar_lea.hbm %s1507_s5, %s930_s25  ;;  %s1450_s22 = int_to_ptr.vmem [resolvable:$true] %s806_s22 }
  0x5b   : > { %s1089_s11 = scalar_lea.vmem %s1450_s22, 256  ;;  %s1197_s30 = smov [#allocation8]  }
  0x5c   : > { %400 = vrot.lane.b32.xlu0 %v385_v15, %s1195_s12  ;;  %294 = vrot.lane.b32.xlu1 %v289_v17, %s1195_s12  ;;  %p1090_p13 = scmp.ne.s32.totalorder %s1450_s22, %s1089_s11 }
  0x5e   : > { %p1091_p3 = pnand %p1090_p13, %p1520_p0 }
  0x60   : > { %290 = vrot.lane.b32.xlu0 %v274_v19, %s1195_s12  ;;  %402 = vrot.lane.b32.xlu1 %v392_v20, %s1195_s12  ;;  %p1092_p5 = pneg %p1091_p3 }
  0x64   : > { %337 = vrot.lane.b32.xlu0 %v327_v21, %s1194_s8  ;;  %444 = vrot.lane.b32.xlu1 %v428_v22, %s1194_s8 }
  0x68   : > { %404 = vrot.lane.b32.xlu0 %v905_v24, %s1195_s12  ;;  %448 = vrot.lane.b32.xlu1 %v443_v25, %s1194_s8 }
  0x6c   : > { %446 = vrot.lane.b32.xlu0 %v385_v15, %s1194_s8  ;;  %511 = vrot.lane.b32.xlu1 %v500_v27, %s1195_s12 }
  0x70   : > { %509 = vrot.lane.b32.xlu0 %v493_v28, %s1195_s12  ;;  %552 = vrot.lane.b32.xlu1 %v500_v27, %s1194_s8 }
  0x74   : > { %513 = vrot.lane.b32.xlu0 %v508_v30, %s1195_s12  ;;  %556 = vrot.lane.b32.xlu1 %v908_v31, %s1194_s8 }
  0x78   : > { %554 = vrot.lane.b32.xlu0 %v544_v32, %s1194_s8 }
  0x7c   : > { %583 = vperm.xlu0 %1022, %v580_v34  }
  0xc3   : > { %v340_v35 = vpop.permute.xlu1 %339 }
  0xc4   : > { %v343_v52 = vrot.slane %v340_v35, 4 }
  0xca   : > { %v293_v36 = vpop.permute.xlu0 %292  ;;  %v336_v37 = vpop.permute.xlu1 %335 }
  0xcb   : > { %v297_v40 = vrot.slane %v293_v36, 4  ;;  %v341_v53 = vrot.slane %v336_v37, 4 }
  0xce   : > { %v401_v38 = vpop.permute.xlu0 %400  ;;  %v295_v39 = vpop.permute.xlu1 %294 }
  0xcf   : > { %v298_v41 = vrot.slane %v295_v39, 4  ;;  %v406_v47 = vrot.slane %v401_v38, 4 }
  0xd1   : > { %v303_v43 = vsel %vm299_vm0, %v297_v40, %v298_v41 }
  0xd2   : > { %v291_v42 = vpop.permute.xlu0 %290  ;;  %v304_v45 = vsel %vm301_vm1, %v293_v36, %v303_v43  ;;  %v403_v46 = vpop.permute.xlu1 %402 }
  0xd3   : > { %v296_v44 = vrot.slane %v291_v42, 4  ;;  %308 = vst [vmem:[#allocation2 + $0x8] sm:$0xcc] %v304_v45  ;;  %v407_v49 = vrot.slane %v403_v46, 4 }
  0xd5   : > { %v300_v48 = vsel %vm299_vm0, %v296_v44, %v297_v40  ;;  %v409_v54 = vsel %vm299_vm0, %v406_v47, %v407_v49 }
  0xd6   : > { %v302_v50 = vsel %vm301_vm1, %v291_v42, %v300_v48  ;;  %v338_v51 = vpop.permute.xlu0 %337  ;;  %v410_v56 = vsel %vm301_vm1, %v401_v38, %v409_v54  ;;  %v445_v57 = vpop.permute.xlu1 %444  ;;  %v749_v54 = vsub.s32 0, %v1368_v3 }
  0xd7   : > { %307 = vst [vmem:[#allocation2] sm:$0xcc] %v302_v50  ;;  %v342_v55 = vrot.slane %v338_v51, 4  ;;  %415 = vst [vmem:[#allocation2 + $0x20] sm:$0x33] %v410_v56  ;;  %v450_v6 = vrot.slane %v445_v57, 4 }
  0xd9   : > { %v344_v58 = vsel %vm299_vm0, %v341_v53, %v342_v55  ;;  %v347_v59 = vsel %vm299_vm0, %v342_v55, %v343_v52  ;;  %v743_v52 = vld [vmem:[%s1503_s1] sm:$0xf]  ;;  %v744_v53 = vstv %s241_s10  ;;  %v757_v55 = vsub.s32 2, %v1368_v3  ;;  %s1093_s10 = sshll.u32 %s1197_s30, 4  ;;  %s1094_s10 = int_to_ptr.vmem [resolvable:$false] %s1093_s10 }
  0xda   : > { %v346_v60 = vsel %vm345_vm2, %v336_v37, %v344_v58  ;;  %v348_v61 = vsel %vm345_vm2, %v338_v51, %v347_v59  ;;  %v405_v62 = vpop.permute.xlu0 %404  ;;  %v449_v0 = vpop.permute.xlu1 %448  ;;  %v569_v51 = vld [vmem:[%s1505_s3] sm:$0xf]  ;;  %vm745_vm5 = vcmp.ge.s32.totalorder %v743_v52, %v744_v53  ;;  %v761_v58 = vsub.s32 3, %v1368_v3  ;;  %s1095_s17 = scalar_lea.vmem %s1094_s10, 512  ;;  %p1096_p11 = scmp.lt.s32.totalorder %s1450_s22, %s1094_s10 }
  0xdb   : > { %351 = vst [vmem:[#allocation2 + $0x10] sm:$0x33] %v346_v60  ;;  %352 = vst [vmem:[#allocation2 + $0x18] sm:$0x33] %v348_v61  ;;  %v408_v63 = vrot.slane %v405_v62, 4  ;;  %v452_v2 = vrot.slane %v449_v0, 4  ;;  %p1097_p4 = scmp.lt.s32.totalorder %s1095_s17, %s1089_s11 }
  0xdc   : > { %v746_v56 = vsel %vm745_vm5, 1, %v1196_v33 }
  0xdd   : > { %v411_v1 = vsel %vm299_vm0, %v407_v49, %v408_v63  ;;  %v750_v61 = vrot.slane %v746_v56, %v749_v54  ;;  %v758_v63 = vrot.slane %v746_v56, %v757_v55  ;;  %p1098_p8 = por %p1097_p4, %p1096_p11 }
  0xde   : > { %v412_v4 = vsel %vm301_vm1, %v403_v46, %v411_v1  ;;  %v447_v5 = vpop.permute.xlu0 %446  ;;  %v512_v8 = vpop.permute.xlu1 %511  ;;  %v570_v12 = vld [vmem:[#allocation2] sm:$0xff] }
  0xdf   : > { %416 = vst [vmem:[#allocation2 + $0x28] sm:$0x33] %v412_v4  ;;  %v451_v7 = vrot.slane %v447_v5, 4  ;;  %v516_v11 = vrot.slane %v512_v8, 4  ;;  %vm763_vm6 = vcmp.eq.s32.totalorder %v750_v61, 1  ;;  %vm765_vm7 = vcmp.eq.s32.totalorder %v758_v63, 1  ;;  %p1099_p10 = pnand %p1098_p8, %p1092_p5 }
  0xe1   : > { %v453_v9 = vsel %vm299_vm0, %v450_v6, %v451_v7  ;;  %v455_v10 = vsel %vm299_vm0, %v451_v7, %v452_v2  ;;  %v762_v6 = vrot.slane %v746_v56, %v761_v58 }
  0xe2   : > { %v454_v13 = vsel %vm345_vm2, %v445_v57, %v453_v9  ;;  %v456_v14 = vsel %vm345_vm2, %v447_v5, %v455_v10  ;;  %v510_v15 = vpop.permute.xlu0 %509  ;;  %v572_v16 = vld [vmem:[#allocation2 + $0x10] sm:$0xff]  ;;  %v1034_v19 = vld [vmem:[#allocation2 + $0xc] ss:$16 sps:$4 sm:$0xff]   ;;  %v1036_v21 = vld [vmem:[#allocation2 + $0x8] ss:$16 sps:$4 sm:$0xff]   ;;  %v553_v22 = vpop.permute.xlu1 %552  ;;  %v753_v57 = vsub.s32 1, %v1368_v3 }
  0xe3   : > { %v1032_v17 = vld [vmem:[#allocation2 + $0x4] ss:$16 sps:$4 sm:$0xff]   ;;  %459 = vst [vmem:[#allocation2 + $0x20] sm:$0xcc] %v454_v13  ;;  %460 = vst [vmem:[#allocation2 + $0x28] sm:$0xcc] %v456_v14  ;;  %v909_v20 = vcombine.low %v570_v12, %v572_v16  ;;  %694 = vmatprep.subr.bf16.mxu1 %v1034_v19 }
  0xe4   : > { %v515_v18 = vrot.slane %v510_v15, 4  ;;  %653 = vmatprep.subr.bf16.mxu0 %v1032_v17  ;;  %695 = vmatpush1.bf16.msra.mxu1 %v1036_v21  ;;  %v558_v32 = vrot.slane %v553_v22, 4  ;;  %v754_v4 = vrot.slane %v746_v56, %v753_v57  ;;  %vm766_vm9 = vcmp.eq.s32.totalorder %v762_v6, 1 }
  0xe5   : > { %654 = vmatpush1.bf16.msra.mxu0 %v909_v20 }
  0xe6   : > { %v518_v23 = vsel %vm299_vm0, %v515_v18, %v516_v11  ;;  %v514_v25 = vpop.permute.xlu0 %513  ;;  %v557_v27 = vpop.permute.xlu1 %556  ;;  %vm764_vm8 = vcmp.eq.s32.totalorder %v754_v4, 1 }
  0xe7   : > { %v519_v24 = vsel %vm301_vm1, %v510_v15, %v518_v23  ;;  %v517_v26 = vrot.slane %v514_v25, 4  ;;  %v560_v29 = vrot.slane %v557_v27, 4 }
  0xe8   : > { %524 = vst [vmem:[#allocation2 + $0x30] sm:$0xcc] %v519_v24 }
  0xe9   : > { %v520_v28 = vsel %vm299_vm0, %v516_v11, %v517_v26 }
  0xea   : > { %v521_v30 = vsel %vm301_vm1, %v512_v8, %v520_v28  ;;  %v555_v31 = vpop.permute.xlu0 %554 }
  0xeb   : > { %525 = vst [vmem:[#allocation2 + $0x38] sm:$0xcc] %v521_v30  ;;  %v559_v34 = vrot.slane %v555_v31, 4 }
  0xed   : > { %v561_v35 = vsel %vm299_vm0, %v558_v32, %v559_v34  ;;  %v563_v36 = vsel %vm299_vm0, %v559_v34, %v560_v29 }
  0xee   : > { %v562_v37 = vsel %vm345_vm2, %v553_v22, %v561_v35  ;;  %v564_v38 = vsel %vm345_vm2, %v555_v31, %v563_v36 }
  0xef   : > { %v1037_v39 = vld [vmem:[#allocation2 + $0x24] ss:$16 sps:$4 sm:$0xff]   ;;  %v1039_v40 = vld [vmem:[#allocation2 + $0x20] ss:$16 sps:$4 sm:$0xff]   ;;  %567 = vst [vmem:[#allocation2 + $0x40] sm:$0x33] %v562_v37 }
  0xf0   : > { %568 = vst [vmem:[#allocation2 + $0x48] sm:$0x33] %v564_v38  ;;  %655 = vmatprep.subr.bf16.mxu0 %v1037_v39 }
  0xf1   : > { %656 = vmatpush1.bf16.msra.mxu0 %v1039_v40 }
  0xf2   : > { %v1040_v41 = vld [vmem:[#allocation2 + $0x2c] ss:$16 sps:$4 sm:$0xff]   ;;  %v1042_v42 = vld [vmem:[#allocation2 + $0x28] ss:$16 sps:$4 sm:$0xff]  }
  0xf3   : > { %696 = vmatprep.subr.bf16.mxu1 %v1040_v41 }
  0xf4   : > { %697 = vmatpush1.bf16.msra.mxu1 %v1042_v42 }
  0xf6   : > { %v578_v43 = vld [vmem:[#allocation2 + $0x40] sm:$0x33] }
  0xf7   : > { %v579_v44 = vld [vmem:[#allocation2 + $0x48] sm:$0x33]  ;;  %v918_v45 = vcombine.high %v578_v43, %v578_v43  ;;  %v917_v47 = vcombine.low %v578_v43, %v578_v43 }
  0xf8   : > { %v920_v46 = vcombine.high %v579_v44, %v579_v44  ;;  %v919_v48 = vcombine.low %v579_v44, %v579_v44 }
  0xf9   : > { %921 = vmatprep.subr.msk.bf16.mxu0 %vm640_vm3, %v918_v45  ;;  %v642_v49 = vsel %vm640_vm3, %v917_v47, 0 }
  0xfa   : > { %923 = vmatprep.subr.msk.bf16.mxu1 %vm640_vm3, %v920_v46  ;;  %v648_v50 = vsel %vm640_vm3, %v919_v48, 0  ;;  %658 = vmatpush1.bf16.msra.mxu0 %v642_v49 }
  0xfb   : > { %699 = vmatpush1.bf16.msra.mxu1 %v648_v50  ;;  %v584_v59 = vpop.permute.xlu0 %583 }
  0xfd   : > { %922 = vmatmul.mubr.msk.bf16.vlgmr.msra.gmra.mrb[0].mxu0 %vm636_vm4, %v569_v51 }
  0xfe   : > { %924 = vmatmul.mubr.msk.bf16.vlgmr.msra.gmra.mrb[0].mxu1 %vm636_vm4, %v569_v51 }
 0x1d0   : > { %v687_v60 = vpop.f32.mrb[0].mxu0 }
 0x1d1   : > { %v728_v62 = vpop.f32.mrb[0].mxu1  ;;  %v688_v0 = vadd.f32 %v687_v60, %v584_v59  ;;  %v689_v2 = vpop.f32.mrb[1].mxu0 }
 0x1d2   : > { %v729_v1 = vadd.f32 %v728_v62, %v584_v59  ;;  %v730_v5 = vpop.f32.mrb[1].mxu1  ;;  %v690_v7 = vadd.f32 %v689_v2, %v584_v59  ;;  %v691_v8 = vpop.f32.mrb[2].mxu0 }
 0x1d3   : > { %v731_v33 = vadd.f32 %v730_v5, %v584_v59  ;;  %v732_v9 = vpop.f32.mrb[2].mxu1  ;;  %v735_v10 = vmax.f32 %v688_v0, 0.0  ;;  %v692_v11 = vpop.f32.mrb[3].mxu0 }
 0x1d4   : > { %v737_v3 = vmax.f32 %v729_v1, 0.0  ;;  %v733_v12 = vpop.f32.mrb[3].mxu1  ;;  %v736_v13 = vmax.f32 %v690_v7, 0.0 }
 0x1d5   : > { %v738_v14 = vmax.f32 %v731_v33, 0.0  ;;  %v739_v15 = vmin.f32 %v735_v10, 20.0 }
 0x1d6   : > { %v741_v16 = vmin.f32 %v737_v3, 20.0  ;;  %v740_v17 = vmin.f32 %v736_v13, 20.0 }
 0x1d7   : > { %v742_v18 = vmin.f32 %v738_v14, 20.0  ;;  %v767_v19 = vsel %vm763_vm6, 0.0, %v739_v15 }
 0x1d8   : > { %v769_v20 = vsel %vm765_vm7, 0.0, %v741_v16  ;;  %v768_v21 = vsel %vm764_vm8, 0.0, %v740_v17 }
 0x1d9   : > { %v770_v22 = vsel %vm766_vm9, 0.0, %v742_v18  ;;  %v933_v23 = vpack.c.bf16 %v768_v21, %v767_v19 }
 0x1da   : > { %v934_v24 = vpack.c.bf16 %v770_v22, %v769_v20 }
 0x1db   : > { %787 = vst [vmem:[%s238_s26] sm:$0xff] %v933_v23 }
 0x1dc   : > { %788 = vst [vmem:[%s238_s26 + $0x8] sm:$0xff] %v934_v24 }
 0x1dd   : > { %1102 = shalt.err (!%p1099_p10)
}
 0x1de   : > { %s1103_s7 = scalar_lea.hbm %s1448_s21, 256  ;;  %s1107_s9 = scalar_lea.hbm %s1507_s5, 1024 }
 0x1df   : > { %p1104_p12 = scmp.ne.s32.totalorder %s1448_s21, %s1103_s7  ;;  %p1108_p6 = scmp.lt.u32.totalorder %s1448_s21, %s1507_s5 }
 0x1e0   : > { %p1109_p7 = scmp.lt.u32.totalorder %s1107_s9, %s1103_s7  ;;  %p1111_p13 = scmp.lt.u32.totalorder %s1103_s7, %s1448_s21 }
 0x1e1   : > { %p1105_p1 = pnand %p1104_p12, %p1520_p0 }
 0x1e2   : > { %p1110_p9 = por %p1109_p7, %p1108_p6 }
 0x1e3   : > { %p1106_p2 = pneg %p1105_p1 }
 0x1e4   : > { %p1112_p3 = por %p1111_p13, %p1110_p9 }
 0x1e6   : > { %p1113_p5 = pnand %p1112_p3, %p1106_p2 }
 0x1e8   : > { %1116 = shalt.err (!%p1113_p5)
}
 0x1e9   : > { %941 = dma.vmem_to_hbm [thread:$0]  (%p1520_p0), %s1450_s22, 256, %s1448_s21, %s790_s6  }
 0x1ea PF: > { %p952_p11 = scmp.ge.s32.totalorder %s1189_s29, 2  ;;  %s818_s25 = sand.u32 1, %s1161_s23  }
 0x1eb   : > { %p1521_p4 = scmp.ne.s32.totalorder %s1516_s16, 0  ;;  %s819_s26 = scalar_lea.sflag [#allocation7], %s818_s25 }
 0x1ed   : > { %p948_p8 = pnand %p952_p11, %p1521_p4 }
 0x1ef   : > { %1156 = dma.done.wait (!%p948_p8), %s819_s26, 256  }
 0x1f0   : > { %1158 = vsyncadd (!%p948_p8), %s819_s26, 4294967040  ;;  %s27_s29 = sadd.s32 1, %s1189_s29   ;;  %s1522_s13 = sld [smem:[#allocation12_spill]] }
 0x1f1   : > { %p24_p10 = scmp.ge.s32.totalorder %s27_s29, 6   ;;  %s1523_s22 = sld [smem:[#allocation13_spill]] }
 0x1f2   : > { %s1524_s23 = smov %s1165_s0  ;;  %s1525_s0 = smov %s1169_s24 }
 0x1f3   : > { %s1526_s24 = smov %s1309_s18  ;;  %s1527_s25 = smov %s1181_s27 }
 0x1f4   : > { %s1528_s26 = smov %s1185_s28  ;;  %26 = sbr.rel (!%p24_p10) target bundleno = 22 (0x16), region = 81 }
 0x1f6   : > { %s1529_s27 = smov %s1522_s13 }
 0x1f7   : > { %s1530_s28 = smov %s1523_s22 }
 0x1fb   :  { %824 = vsyncpa [#allocation6], 1 }
 0x1fc   :  { %826 = vsyncpa [#allocation6 + $0x1], 1 }
 0x1fd   :  { %827 = vsyncpa [#allocation7], 1 }
 0x1fe   :  { %829 = vsyncpa [#allocation7 + $0x1], 1 }

</bundles_post_ra>
